<compile_context>
chip_gen: v7x
topology: tpu7x:2x2x1
jax: 0.10.0
libtpu: 0.0.40
codegen_flags: <defaults>
</compile_context>

<pallas_src>
import math

import jax
import jax.numpy as jnp
from jax.experimental import pallas as pl
from jax.experimental.pallas import tpu as pltpu


def mhga_kernel(x_ref, adj_ref, w_ref, a_ref, o_ref, h_sc, ssrc_sc, sdst_sc):
    rt = pl.program_id(1)
    tm = o_ref.shape[1]

    # ---- once per head: transformed features + score halves (all on the MXU) ----
    @pl.when(rt == 0)
    def _():
        x = x_ref[...]                                    # (N, 2*f_in)  f32
        w = w_ref[0]                                      # (2*f_in, F)  f32, F = padded f_out
        h = jnp.dot(x, w, preferred_element_type=jnp.float32)      # (N, F) f32
        h_sc[...] = h.astype(jnp.bfloat16)                # RHS of the aggregation matmul
        a = a_ref[0]                                      # (2, F): row0 = a_src, row1 = a_dst
        # s_src = h . a_src -> (N, 1)   s_dst = a_dst . h -> (1, N)   (no XLU transpose)
        ssrc_sc[...] = jax.lax.dot_general(
            h, a[0:1, :], (((1,), (1,)), ((), ())),
            preferred_element_type=jnp.float32)           # (N, 1)
        sdst_sc[...] = jax.lax.dot_general(
            a[1:2, :], h, (((1,), (1,)), ((), ())),
            preferred_element_type=jnp.float32)           # (1, N)

    # ---- per (TM, N) row slab ----
    row0 = pl.multiple_of(rt * tm, tm)
    s_src = ssrc_sc[pl.ds(row0, tm), :]                   # (TM, 1) f32
    score = s_src + sdst_sc[...]                          # (TM, N) f32
    leaky = jnp.where(score > 0, score, 0.2 * score)      # LeakyReLU(0.2)
    # evaluate exp only where an edge exists (masked non-edge exp could overflow -> inf*0=NaN)
    edge_e = jnp.where(adj_ref[...] > 0, jnp.exp(-leaky), 0.0)     # (TM, N) f32
    e_rowsum = jnp.sum(edge_e, axis=-1, keepdims=True)    # (TM, 1) f32

    # aggregation matmul: bf16 operands, f32 accumulation
    h_prime = jnp.dot(edge_e.astype(jnp.bfloat16), h_sc[...],
                      preferred_element_type=jnp.float32)          # (TM, F) f32

    inv = pl.reciprocal(e_rowsum + 1e-12, approx=True)    # EUP; eps guards 0-degree rows
    o_ref[0] = h_prime * inv                              # lane-dense (TM, F) store


def multi_head_graph_attention(x, adj_dense, w, a_src_dst, *, tm=None):
    """x: (N, 2*f_in) f32; adj_dense: (N, N) 0/1; w: (n_head, 2*f_in, f_out);
       a_src_dst: (n_head, 2*f_out, 1).  Returns (n_head, N, f_out) f32."""
    n_head, f_in2, f_out = w.shape
    N = x.shape[0]
    if tm is None:
        tm = min(N, 256)
    assert tm % 8 == 0 and N % tm == 0, "node tile must be a multiple of 8 dividing N"

    f_pad = ((f_out + 127) // 128) * 128                  # lane-dense (padded) feature width
    pad = f_pad - f_out

    x = x.astype(jnp.float32)
    adj_bf16 = adj_dense.astype(jnp.bfloat16)             # 0/1 mask is exact in bf16
    w_p = jnp.pad(w.astype(jnp.float32), ((0, 0), (0, 0), (0, pad)))
    a = jnp.stack([a_src_dst[:, :f_out, 0], a_src_dst[:, f_out:, 0]], axis=1)
    a_p = jnp.pad(a.astype(jnp.float32), ((0, 0), (0, 0), (0, pad)))   # (n_head, 2, f_pad)

    out = pl.pallas_call(
        mhga_kernel,
        out_shape=jax.ShapeDtypeStruct((n_head, N, f_pad), jnp.float32),
        grid=(n_head, N // tm),
        in_specs=[
            pl.BlockSpec((N, f_in2), lambda hd, rt: (0, 0)),            # x (shared)
            pl.BlockSpec((tm, N), lambda hd, rt: (rt, 0)),              # adj row slab (bf16)
            pl.BlockSpec((1, f_in2, f_pad), lambda hd, rt: (hd, 0, 0)),  # w[head]
            pl.BlockSpec((1, 2, f_pad), lambda hd, rt: (hd, 0, 0)),      # [a_src; a_dst][head]
        ],
        out_specs=pl.BlockSpec((1, tm, f_pad), lambda hd, rt: (hd, rt, 0)),
        scratch_shapes=[
            pltpu.VMEM((N, f_pad), jnp.bfloat16),   # per-head h (aggregation RHS)
            pltpu.VMEM((N, 1), jnp.float32),        # s_src column
            pltpu.VMEM((1, N), jnp.float32),        # s_dst row
        ],
        compiler_params=pltpu.CompilerParams(
            dimension_semantics=("parallel", "arbitrary"),
            vmem_limit_bytes=48 * 1024 * 1024),
    )(x, adj_bf16, w_p, a_p)
    return out[..., :f_out]


def reference_jax(x, adj_dense, w, a_src_dst):
    """Pure f32 JAX reference with the PyTorch module's math."""
    n_head, _, f_out = w.shape
    outs = []
    for i in range(n_head):
        h = x @ w[i]
        a_src = a_src_dst[i, :f_out, 0]
        a_dst = a_src_dst[i, f_out:, 0]
        score = (h @ a_src)[:, None] + (h @ a_dst)[None, :]
        leaky = jnp.where(score > 0, score, 0.2 * score)
        ee = jnp.where(adj_dense > 0, jnp.exp(-leaky), 0.0)
        rowsum = jnp.sum(ee, axis=-1, keepdims=True)
        outs.append((ee @ h) / rowsum)
    return jnp.stack(outs, axis=0)


if __name__ == "__main__":
    # Module hyper-params (diag=False, bias=False, attn_dropout=0.0, eval mode)
    n_head = 2
    f_in = 16           # module doubles this internally -> f_in2 = 32
    f_in2 = 2 * f_in
    f_out = 32
    N = 64

    key = jax.random.PRNGKey(0)
    k_x, k_adj, k_w, k_a = jax.random.split(key, 4)

    # node features (N, 2*f_in)
    x = jax.random.normal(k_x, (N, f_in2), dtype=jnp.float32)

    # deterministic sparse adjacency -> dense 0/1 mask, with self-loops so every row
    # has at least one edge (matches the PyTorch div-by-rowsum assumption).
    adj_rand = jax.random.bernoulli(k_adj, p=0.25, shape=(N, N))
    adj_dense = jnp.maximum(adj_rand.astype(jnp.float32), jnp.eye(N, dtype=jnp.float32))

    # xavier_uniform-style deterministic init (same shapes as the nn.Parameters)
    bound_w = math.sqrt(6.0 / (f_in2 * f_out + n_head * f_out))
    w = jax.random.uniform(k_w, (n_head, f_in2, f_out),
                           minval=-bound_w, maxval=bound_w, dtype=jnp.float32)
    bound_a = math.sqrt(6.0 / (2 * f_out * 1 + n_head * 1))
    a_src_dst = jax.random.uniform(k_a, (n_head, 2 * f_out, 1),
                                   minval=-bound_a, maxval=bound_a, dtype=jnp.float32)

    out = multi_head_graph_attention(x, adj_dense, w, a_src_dst, tm=32)
    out = jax.block_until_ready(out)

    ref = reference_jax(x, adj_dense, w, a_src_dst)
    assert out.shape == (n_head, N, f_out)
    assert not bool(jnp.any(jnp.isnan(out))), "NaN in kernel output"
    max_err = float(jnp.max(jnp.abs(out - ref)))
    # bf16 operands in the aggregation matmul + approx reciprocal -> compare with a
    # tolerance consistent with bf16 rounding against the full-f32 reference.
    assert jnp.allclose(out, ref, atol=2e-2, rtol=2e-2), f"mismatch vs ref, max_err={max_err}"

    print("KERNEL_OK")
</pallas_src>

<mosaic_0001>
module attributes {stable_mosaic.version = 11 : i64} {
  func.func @mhga_kernel(%arg0: i32, %arg1: i32, %arg2: memref<64x32xf32, #tpu.memory_space<vmem>>, %arg3: memref<32x64xbf16, #tpu.memory_space<vmem>>, %arg4: memref<1x32x128xf32, #tpu.memory_space<vmem>>, %arg5: memref<1x2x128xf32, #tpu.memory_space<vmem>>, %arg6: memref<1x32x128xf32, #tpu.memory_space<vmem>>, %arg7: memref<64x128xbf16, #tpu.memory_space<vmem>>, %arg8: memref<64x1xf32, #tpu.memory_space<vmem>>, %arg9: memref<1x64xf32, #tpu.memory_space<vmem>>) attributes {dimension_semantics = [#tpu.dimension_semantics<parallel>, #tpu.dimension_semantics<arbitrary>], iteration_bounds = array<i64: 2, 2>, scalar_prefetch = 0 : i64, scratch_operands = 3 : i64, tpu.core_type = #tpu.core_type<tc>, window_params = [{pipeline_mode = #tpu.pipeline_mode<synchronous>, transform_indices = @transform_0, window_bounds = array<i64: 64, 32>}, {transform_indices = @transform_1, window_bounds = array<i64: 32, 64>}, {transform_indices = @transform_2, window_bounds = array<i64: 1, 32, 128>}, {transform_indices = @transform_3, window_bounds = array<i64: 1, 2, 128>}, {transform_indices = @transform_4, window_bounds = array<i64: 1, 32, 128>}]} {
    %c0_i32 = arith.constant 0 : i32
    %0 = arith.cmpi eq, %arg1, %c0_i32 : i32
    %1 = arith.extui %0 : i1 to i32
    %c0_i32_0 = arith.constant 0 : i32
    %2 = arith.cmpi ne, %1, %c0_i32_0 : i32
    scf.if %2 {
      %c0_17 = arith.constant 0 : index
      %c0_18 = arith.constant 0 : index
      %37 = vector.load %arg2[%c0_17, %c0_18] : memref<64x32xf32, #tpu.memory_space<vmem>>, vector<64x32xf32>
      %c0_19 = arith.constant 0 : index
      %c0_20 = arith.constant 0 : index
      %c0_21 = arith.constant 0 : index
      %38 = vector.load %arg4[%c0_19, %c0_20, %c0_21] : memref<1x32x128xf32, #tpu.memory_space<vmem>>, vector<1x32x128xf32>
      %39 = vector.shape_cast %38 : vector<1x32x128xf32> to vector<32x128xf32>
      %cst_22 = arith.constant dense<0.000000e+00> : vector<64x128xf32>
      %40 = tpu.matmul %37, %39, %cst_22 {dimension_numbers = #tpu.dot_dimension_numbers<[1], [0], [0], [1], [0, 0, 1, 1], [], []>} : vector<64x32xf32>, vector<32x128xf32>, vector<64x128xf32> -> vector<64x128xf32>
      %41 = arith.truncf %40 : vector<64x128xf32> to vector<64x128xbf16>
      %c0_23 = arith.constant 0 : index
      %c0_24 = arith.constant 0 : index
      %42 = vector.load %arg7[%c0_23, %c0_24] : memref<64x128xbf16, #tpu.memory_space<vmem>>, vector<64x128xbf16>
      tpu.vector_store %arg7[%c0_23, %c0_24], %41 {strides = array<i32>} : memref<64x128xbf16, #tpu.memory_space<vmem>>, vector<64x128xbf16>,
      %c0_25 = arith.constant 0 : index
      %c0_26 = arith.constant 0 : index
      %c0_27 = arith.constant 0 : index
      %43 = vector.load %arg5[%c0_25, %c0_26, %c0_27] : memref<1x2x128xf32, #tpu.memory_space<vmem>>, vector<1x2x128xf32>
      %44 = vector.shape_cast %43 : vector<1x2x128xf32> to vector<2x128xf32>
      %45 = vector.extract_strided_slice %44 {offsets = [0, 0], sizes = [1, 128], strides = [1, 1]} : vector<2x128xf32> to vector<1x128xf32>
      %cst_28 = arith.constant dense<0.000000e+00> : vector<64x1xf32>
      %46 = tpu.matmul %40, %45, %cst_28 {dimension_numbers = #tpu.dot_dimension_numbers<[1], [1], [0], [0], [0, 0, 1, 0], [], []>} : vector<64x128xf32>, vector<1x128xf32>, vector<64x1xf32> -> vector<64x1xf32>
      %c0_29 = arith.constant 0 : index
      %c0_30 = arith.constant 0 : index
      %47 = vector.load %arg8[%c0_29, %c0_30] : memref<64x1xf32, #tpu.memory_space<vmem>>, vector<64x1xf32>
      tpu.vector_store %arg8[%c0_29, %c0_30], %46 {strides = array<i32>} : memref<64x1xf32, #tpu.memory_space<vmem>>, vector<64x1xf32>,
      %48 = vector.extract_strided_slice %44 {offsets = [1, 0], sizes = [1, 128], strides = [1, 1]} : vector<2x128xf32> to vector<1x128xf32>
      %cst_31 = arith.constant dense<0.000000e+00> : vector<1x64xf32>
      %49 = tpu.matmul %48, %40, %cst_31 {dimension_numbers = #tpu.dot_dimension_numbers<[1], [1], [0], [0], [0, 0, 1, 0], [], []>} : vector<1x128xf32>, vector<64x128xf32>, vector<1x64xf32> -> vector<1x64xf32>
      %c0_32 = arith.constant 0 : index
      %c0_33 = arith.constant 0 : index
      %50 = vector.load %arg9[%c0_32, %c0_33] : memref<1x64xf32, #tpu.memory_space<vmem>>, vector<1x64xf32>
      tpu.vector_store %arg9[%c0_32, %c0_33], %49 {strides = array<i32>} : memref<1x64xf32, #tpu.memory_space<vmem>>, vector<1x64xf32>,
    } else {
    }
    %c32_i32 = arith.constant 32 : i32
    %3 = arith.muli %arg1, %c32_i32 : i32
    %4 = tpu.assume_multiple %3, 32 : i32
    %5 = arith.index_cast %4 : i32 to index
    %c0 = arith.constant 0 : index
    %6 = vector.load %arg8[%5, %c0] : memref<64x1xf32, #tpu.memory_space<vmem>>, vector<32x1xf32>
    %c0_1 = arith.constant 0 : index
    %c0_2 = arith.constant 0 : index
    %7 = vector.load %arg9[%c0_1, %c0_2] : memref<1x64xf32, #tpu.memory_space<vmem>>, vector<1x64xf32>
    %8 = vector.broadcast %6 : vector<32x1xf32> to vector<32x64xf32>
    %9 = vector.broadcast %7 : vector<1x64xf32> to vector<32x64xf32>
    %10 = arith.addf %8, %9 : vector<32x64xf32>
    %cst = arith.constant 0.000000e+00 : f32
    %11 = vector.broadcast %cst : f32 to vector<32x64xf32>
    %12 = arith.cmpf ogt, %10, %11 : vector<32x64xf32>
    %cst_3 = arith.constant 2.000000e-01 : f32
    %13 = vector.broadcast %cst_3 : f32 to vector<32x64xf32>
    %14 = arith.mulf %13, %10 : vector<32x64xf32>
    %15 = arith.select %12, %10, %14 : vector<32x64xi1>, vector<32x64xf32>
    %c0_4 = arith.constant 0 : index
    %c0_5 = arith.constant 0 : index
    %16 = vector.load %arg3[%c0_4, %c0_5] : memref<32x64xbf16, #tpu.memory_space<vmem>>, vector<32x64xbf16>
    %cst_6 = arith.constant 0.000000e+00 : bf16
    %17 = vector.broadcast %cst_6 : bf16 to vector<32x64xbf16>
    %18 = arith.cmpf ogt, %16, %17 : vector<32x64xbf16>
    %cst_7 = arith.constant 0.000000e+00 : f32
    %19 = vector.broadcast %cst_7 : f32 to vector<32x64xf32>
    %20 = arith.subf %19, %15 : vector<32x64xf32>
    %21 = math.exp %20 : vector<32x64xf32>
    %cst_8 = arith.constant 0.000000e+00 : f32
    %22 = vector.broadcast %cst_8 : f32 to vector<32x64xf32>
    %23 = arith.select %18, %21, %22 : vector<32x64xi1>, vector<32x64xf32>
    %cst_9 = arith.constant dense<0.000000e+00> : vector<32xf32>
    %24 = vector.multi_reduction <add>, %23, %cst_9 [1] : vector<32x64xf32> to vector<32xf32>
    %25 = vector.shape_cast %24 : vector<32xf32> to vector<32x1xf32>
    %26 = arith.truncf %23 : vector<32x64xf32> to vector<32x64xbf16>
    %c0_10 = arith.constant 0 : index
    %c0_11 = arith.constant 0 : index
    %27 = vector.load %arg7[%c0_10, %c0_11] : memref<64x128xbf16, #tpu.memory_space<vmem>>, vector<64x128xbf16>
    %cst_12 = arith.constant dense<0.000000e+00> : vector<32x128xf32>
    %28 = tpu.matmul %26, %27, %cst_12 {dimension_numbers = #tpu.dot_dimension_numbers<[1], [0], [0], [1], [0, 0, 1, 1], [], []>} : vector<32x64xbf16>, vector<64x128xbf16>, vector<32x128xf32> -> vector<32x128xf32>
    %cst_13 = arith.constant 9.99999996E-13 : f32
    %29 = vector.broadcast %cst_13 : f32 to vector<32x1xf32>
    %30 = arith.addf %25, %29 : vector<32x1xf32>
    %31 = tpu.reciprocal %30 {approx = true} : vector<32x1xf32> -> vector<32x1xf32>
    %32 = vector.broadcast %31 : vector<32x1xf32> to vector<32x128xf32>
    %33 = arith.mulf %28, %32 : vector<32x128xf32>
    %c0_14 = arith.constant 0 : index
    %c0_15 = arith.constant 0 : index
    %c0_16 = arith.constant 0 : index
    %34 = vector.load %arg6[%c0_14, %c0_15, %c0_16] : memref<1x32x128xf32, #tpu.memory_space<vmem>>, vector<1x32x128xf32>
    %35 = vector.shape_cast %34 : vector<1x32x128xf32> to vector<32x128xf32>
    %36 = vector.shape_cast %33 : vector<32x128xf32> to vector<1x32x128xf32>
    tpu.vector_store %arg6[%c0_14, %c0_15, %c0_16], %36 {strides = array<i32>} : memref<1x32x128xf32, #tpu.memory_space<vmem>>, vector<1x32x128xf32>,
    return
  }
  func.func @transform_0(%arg0: i32, %arg1: i32) -> (i32, i32) {
    %c0_i32 = arith.constant 0 : i32
    %c0_i32_0 = arith.constant 0 : i32
    %c0_i32_1 = arith.constant 0 : i32
    return %c0_i32, %c0_i32_0 : i32, i32
  }
  func.func @transform_1(%arg0: i32, %arg1: i32) -> (i32, i32) {
    %c0_i32 = arith.constant 0 : i32
    %c0_i32_0 = arith.constant 0 : i32
    return %arg1, %c0_i32 : i32, i32
  }
  func.func @transform_2(%arg0: i32, %arg1: i32) -> (i32, i32, i32) {
    %c0_i32 = arith.constant 0 : i32
    %c0_i32_0 = arith.constant 0 : i32
    %c0_i32_1 = arith.constant 0 : i32
    return %arg0, %c0_i32, %c0_i32_0 : i32, i32, i32
  }
  func.func @transform_3(%arg0: i32, %arg1: i32) -> (i32, i32, i32) {
    %c0_i32 = arith.constant 0 : i32
    %c0_i32_0 = arith.constant 0 : i32
    %c0_i32_1 = arith.constant 0 : i32
    return %arg0, %c0_i32, %c0_i32_0 : i32, i32, i32
  }
  func.func @transform_4(%arg0: i32, %arg1: i32) -> (i32, i32, i32) {
    %c0_i32 = arith.constant 0 : i32
    %c0_i32_0 = arith.constant 0 : i32
    return %arg0, %arg1, %c0_i32 : i32, i32, i32
  }
}

</mosaic_0001>

<bundles_post_ra>
// kernel: tpu_custom_call.1
= control target key start
LH: loop header
LB: loop body
LE: loop exit
PB: predicated region body
PF: predicated region fallthrough
CT: control target
= control target key end

     0   :  { %9 = vsyncpa [#allocation6], 0  ;;  %s1388_s0 = inlined_call_operand.vmem [shape: f32[64,32], index: 0, kind: input, shape index: {}]   ;;  %s1389_s1 = inlined_call_operand.vmem [shape: bf16[64,64], index: 1, kind: input, shape index: {}]   ;;  %s1390_s2 = inlined_call_operand.vmem [shape: f32[2,32,128], index: 2, kind: input, shape index: {}]   ;;  %s1391_s3 = inlined_call_operand.vmem [shape: f32[2,2,128], index: 3, kind: input, shape index: {}]   ;;  %s1392_s4 = inlined_call_operand.hbm [shape: f32[2,64,128], index: 4, kind: output, shape index: {}]  }
   0x1   :  { %11 = vsyncpa [#allocation6 + $0x1], 0  ;;  %s1165_s15 = smov 0   ;;  %s1167_s16 = smov 0  }
   0x2   :  { %s1169_s17 = smov 0   ;;  %s1171_s18 = smov 0  }
   0x3   :  { %s1173_s19 = smov 0   ;;  %s1175_s20 = smov 0  }
   0x4   :  { %s1177_s21 = smov 0   ;;  %s1179_s22 = smov 0  }
   0x5 LB: > { %1398 = sst [smem:[#allocation8_spill]] %s1123_s20  ;;  %s813_s23 = sadd.s32 4294967295, %s1131_s22   ;;  %s1131_s22 = sphi %s1179_s22, %s17_s22   ;;  %s1127_s21 = sphi %s1177_s21, %s1408_s21   ;;  %s1123_s20 = sphi %s1175_s20, %s1407_s20   ;;  %s1119_s19 = sphi %s1173_s19, %s1406_s19   ;;  %s1115_s18 = sphi %s1171_s18, %s1405_s18   ;;  %s1111_s17 = sphi %s1169_s17, %s1411_s17   ;;  %s1107_s16 = sphi %s1167_s16, %s1410_s16   ;;  %s1103_s15 = sphi %s1165_s15, %s1409_s15  }
   0x6   : > { %1399 = sst [smem:[#allocation9_spill]] %s1127_s21  ;;  %s814_s24 = sadd.s32 4294967294, %s1131_s22  }
   0x7   : > { %s26_s25 = sadd.s32 1, %s1123_s20  ;;  %s29_s26 = sadd.s32 1, %s1127_s21 }
   0x8   : > { %p27_p0 = scmp.ge.s32.totalorder %s26_s25, 2  ;;  %p147_p1 = scmp.ne.s32.totalorder %s1111_s17, %s1107_s16 }
   0x9   : > { %p148_p2 = scmp.eq.s32.totalorder %s813_s23, 3  ;;  %p153_p5 = scmp.ne.s32.totalorder %s1107_s16, %s1103_s15 }
   0xa   : > { %s1413_s25 = smov (%p27_p0, %s26_s25), 0  ;;  %s1415_s26 = smov (!%p27_p0, %s29_s26), %s1127_s21 }
   0xb   : > { %1400 = sst [smem:[#allocation10_spill]] %s1413_s25  ;;  %s133_s27 = ssub.s32 %s1123_s20, %s1413_s25 }
   0xc   : > { %p1216_p3 = por %p148_p2, %p147_p1  ;;  %p31_p4 = scmp.ge.s32.totalorder %s1415_s26, 2 }
   0xd   : > { %p154_p6 = scmp.eq.s32.totalorder %s814_s24, 3  ;;  %p817_p7 = scmp.ge.s32.totalorder %s1131_s22, 1 }
   0xe   : > { %s1417_s26 = smov (%p31_p4, %s1415_s26), 0  ;;  %p199_p9 = scmp.lt.s32.totalorder %s1131_s22, 5 }
   0xf   : > { %1402 = sst [smem:[#allocation11_spill]] %s1417_s26  ;;  %p1225_p8 = por %p154_p6, %p153_p5 }
  0x10   : > { %s132_s30 = ssub.s32 %s1127_s21, %s1417_s26  ;;  %s137_s5 = sadd.s32 1, %s1111_s17 }
  0x11   : > { %s134_s6 = sor.u32 %s133_s27, %s132_s30  ;;  %p200_p10 = pnand %p817_p7, %p199_p9 }
  0x12   : > { %p135_p11 = scmp.eq.s32.totalorder %s134_s6, 0  ;;  %s1396_s8 = sand.u32 (!%p200_p10), 1, %s1107_s16  }
  0x13   : > { %203 = sbr.rel (%p200_p10) target bundleno = 893 (0x37d), region = 36  ;;  %s1238_s9 = sshll.u32 (!%p200_p10), %s1115_s18, 2 }
  0x14   : > { %s1234_s7 = scalar_select %p135_p11, %s1111_s17, %s137_s5  }
  0x15   : > { %s818_s10 = sshll.u32 (!%p200_p10), %s1396_s8, 5  ;;  %p235_p12 = scmp.lt.s32.totalorder (!%p200_p10), %s1238_s9, 7 }
  0x16   : > { %p240_p13 = scmp.lt.s32.totalorder (!%p200_p10), %s1119_s19, 1  ;;  %s1259_s20 = scalar_lea.vmem (!%p200_p10), [#allocation5], %s818_s10 }
  0x17   : > { %p824_p0 = scmp.ne.s32.totalorder (!%p200_p10), %s1115_s18, 0 }
  0x1a   : > { %s236_s11 = scalar_select %p235_p12, %s1238_s9, 7 }
  0x1b   : > { %s241_s12 = scalar_select %p240_p13, %s1119_s19, 1 }
  0x1c   : > { %s820_s13 = sshll.u32 %s236_s11, 2  ;;  %256 = sbr.rel (%p824_p0) target bundleno = 501 (0x1f5), region = 40  ;;  %vm269_vm0 = vcmask (!%p824_p0), 261120   ;;  %v257_v5 = vld [vmem:[%s1388_s0] sm:$0xff] (!%p824_p0)  ;;  %v258_v7 = vld [vmem:[%s1388_s0 + $0x8] sm:$0xff] (!%p824_p0)  ;;  %v259_v8 = vld [vmem:[%s1388_s0 + $0x10] sm:$0xff] (!%p824_p0)  ;;  %v408_v16 = vlaneseq (!%p824_p0) }
  0x1d   : > { %s1249_s24 = scalar_lea.vmem %s1389_s1, %s820_s13  ;;  %s843_s27 = sshll.u32 %s241_s12, 5  ;;  %879 = vmatprep.mubr.msk.f32.mxu0 (!%p824_p0), %vm269_vm0, %v257_v5  ;;  %v260_v9 = vld [vmem:[%s1388_s0 + $0x18] sm:$0xff] (!%p824_p0)  ;;  %v261_v10 = vld [vmem:[%s1388_s0 + $0x20] sm:$0xff] (!%p824_p0)  ;;  %v262_v11 = vld [vmem:[%s1388_s0 + $0x28] sm:$0xff] (!%p824_p0)  ;;  %v1133_v14 = vmov (!%p824_p0), 0.0|0.0   ;;  %vm1134_vm1 = vmmov (!%p824_p0), 0  }
  0x1e   : > { %s244_s6 = scalar_lea.vmem %s1390_s2, %s843_s27  ;;  %s823_s26 = sshll.u32 %s241_s12, 1  ;;  %v263_v12 = vld [vmem:[%s1388_s0 + $0x30] sm:$0xff] (!%p824_p0)  ;;  %v264_v13 = vld [vmem:[%s1388_s0 + $0x38] sm:$0xff] (!%p824_p0)  ;;  %930 = vmatprep.subr.bf16.mxu1 (!%p824_p0), %v1133_v14  ;;  %v1135_v15 = vmov (!%p824_p0), 0.0   ;;  %v409_v17 = vshrl.u32 (!%p824_p0), %v408_v16, 7  ;;  %vm436_vm2 = vcmask (!%p824_p0), 7168  }
  0x1f   : > { %s1257_s8 = scalar_lea.vmem %s1391_s3, %s823_s26  ;;  %v265_v0 = vld [vmem:[%s244_s6] sm:$0xff] (!%p824_p0)  ;;  %v266_v1 = vld [vmem:[%s244_s6 + $0x8] sm:$0xff] (!%p824_p0)  ;;  %v267_v2 = vld [vmem:[%s244_s6 + $0x10] sm:$0xff] (!%p824_p0)  ;;  %907 = vmatprep.mubr.msk.f32.mxu1 (!%p824_p0), %vm1134_vm1, %v1135_v15  ;;  %vm518_vm3 = vcmask (!%p824_p0), 516096  }
  0x20   : > { %v922_v3 = vpack.c.bf16 (!%p824_p0), %v266_v1, %v265_v0  ;;  %v268_v4 = vld [vmem:[%s244_s6 + $0x18] sm:$0xff] (!%p824_p0)  ;;  %v410_v18 = vsub.s32 (!%p824_p0), 0, %v409_v17  ;;  %v407_v19 = vld [vmem:[%s1257_s8] sm:$0x3] (!%p824_p0) }
  0x21   : > { %v926_v6 = vpack.c.bf16 (!%p824_p0), %v268_v4, %v267_v2  ;;  %v446_v41 = vrot.slane (!%p824_p0), %v407_v19, 1 }
  0x22   : > { %923 = vmatprep.subr.bf16.mxu0 (!%p824_p0), %v922_v3  ;;  %v411_v20 = vrot.slane (!%p824_p0), %v407_v19, %v410_v18 }
  0x23   : > { %925 = vmatpush3.bf16.msra.mxu0 %v922_v3 }
  0x24   : > { %927 = vmatprep.subr.bf16.mxu0 %v926_v6 }
  0x27   : > { %929 = vmatpush3.bf16.msra.mxu0 %v926_v6 }
  0x2a   : > { %880 = vmatmul.mubr.msk.f32.vlgmr.msra.gmra.mrb[0].mxu0 %vm269_vm0, %v258_v7 }
  0x2b   : > { %882 = vmatprep.mubr.msk.f32.mxu0 %vm269_vm0, %v259_v8 }
  0x2e   : > { %883 = vmatmul.mubr.msk.f32.gmra.mrb[2].mxu0 %vm269_vm0, %v260_v9 }
  0x2f   : > { %885 = vmatprep.mubr.msk.f32.mxu0 %vm269_vm0, %v261_v10 }
  0x32   : > { %886 = vmatmul.mubr.msk.f32.gmra.mrb[4].mxu0 %vm269_vm0, %v262_v11 }
  0x33   : > { %888 = vmatprep.mubr.msk.f32.mxu0 %vm269_vm0, %v263_v12 }
  0x36   : > { %889 = vmatmul.mubr.msk.f32.gmra.mrb[6].mxu0 %vm269_vm0, %v264_v13 }
  0xfd   : > { %v881_v21 = vpop.f32.mrb[0].mxu0 }
  0xfe   : > { %v360_v22 = vpop.f32.mrb[1].mxu0  ;;  %v413_v23 = vmul.f32 %v881_v21, %v411_v20 }
  0xff   : > { %v399_v24 = vpack.c.bf16 %v881_v21, %v360_v22  ;;  %v412_v26 = vmul.f32 %v411_v20, %v360_v22 }
 0x100   : > { %422 = vadd.xlane.f32.xlu0 %v413_v23 }
 0x101   : > { %v884_v25 = vpop.f32.mrb[2].mxu0  ;;  %403 = vst [vmem:[#allocation2] sm:$0xff] %v399_v24  ;;  %932 = vmatpush3.bf16.xpose.msra.mxu1 %v399_v24 }
 0x102   : > { %v415_v27 = vmul.f32 %v884_v25, %v411_v20  ;;  %v370_v28 = vpop.f32.mrb[3].mxu0  ;;  %933 = vmatprep.subr.bf16.mxu1 %v1133_v14 }
 0x103   : > { %v400_v29 = vpack.c.bf16 %v884_v25, %v370_v28  ;;  %v414_v30 = vmul.f32 %v411_v20, %v370_v28 }
 0x104   : > { %420 = vadd.xlane.f32.xlu0 %v412_v26  ;;  %426 = vadd.xlane.f32.xlu1 %v415_v27 }
 0x105   : > { %404 = vst [vmem:[#allocation2 + $0x8] sm:$0xff] %v400_v29  ;;  %v887_v31 = vpop.f32.mrb[4].mxu0 }
 0x106   : > { %v380_v32 = vpop.f32.mrb[5].mxu0  ;;  %v417_v35 = vmul.f32 %v887_v31, %v411_v20 }
 0x107   : > { %v401_v33 = vpack.c.bf16 %v887_v31, %v380_v32  ;;  %v416_v34 = vmul.f32 %v411_v20, %v380_v32 }
 0x108   : > { %424 = vadd.xlane.f32.xlu1 %v414_v30 }
 0x109   : > { %935 = vmatpush3.bf16.xpose.msra.mxu1 %v400_v29  ;;  %405 = vst [vmem:[#allocation2 + $0x10] sm:$0xff] %v401_v33  ;;  %428 = vadd.xlane.f32.xlu0 %v416_v34  ;;  %v890_v36 = vpop.f32.mrb[6].mxu0 }
 0x10a   : > { %936 = vmatprep.subr.bf16.mxu1 %v1133_v14  ;;  %v390_v37 = vpop.f32.mrb[7].mxu0  ;;  %v419_v40 = vmul.f32 %v890_v36, %v411_v20 }
 0x10b   : > { %v402_v38 = vpack.c.bf16 %v890_v36, %v390_v37  ;;  %v418_v39 = vmul.f32 %v411_v20, %v390_v37 }
 0x10c   : > { %430 = vadd.xlane.f32.xlu1 %v417_v35 }
 0x10d   : > { %406 = vst [vmem:[#allocation2 + $0x18] sm:$0xff] %v402_v38  ;;  %432 = vadd.xlane.f32.xlu0 %v418_v39 }
 0x110   : > { %434 = vadd.xlane.f32.xlu1 %v419_v40 }
 0x111   : > { %938 = vmatpush3.bf16.xpose.msra.mxu1 %v401_v33 }
 0x112   : > { %939 = vmatprep.subr.bf16.mxu1 %v1133_v14 }
 0x119   : > { %941 = vmatpush3.bf16.xpose.msra.mxu1 %v402_v38 }
 0x120   : > { %908 = vmatmul.mubr.f32.vlgmr.msra.gmra.mrb[0].mxu1 %v446_v41 }
 0x18d   : > { %v423_v42 = vpop.xlane.xlu0 %422 }
 0x18e   : > { %438 = vst.msk [vmem:[#allocation3 + $0x8] sm:$0xff] %vm436_vm2, %v423_v42 }
 0x191   : > { %v421_v43 = vpop.xlane.xlu0 %420  ;;  %v427_v44 = vpop.xlane.xlu1 %426 }
 0x192   : > { %437 = vst.msk [vmem:[#allocation3] sm:$0xff] %vm436_vm2, %v421_v43  ;;  %440 = vst.msk [vmem:[#allocation3 + $0x18] sm:$0xff] %vm436_vm2, %v427_v44 }
 0x195   : > { %v425_v45 = vpop.xlane.xlu1 %424 }
 0x196   : > { %439 = vst.msk [vmem:[#allocation3 + $0x10] sm:$0xff] %vm436_vm2, %v425_v45  ;;  %v429_v46 = vpop.xlane.xlu0 %428 }
 0x197   : > { %441 = vst.msk [vmem:[#allocation3 + $0x20] sm:$0xff] %vm436_vm2, %v429_v46 }
 0x199   : > { %v431_v47 = vpop.xlane.xlu1 %430 }
 0x19a   : > { %442 = vst.msk [vmem:[#allocation3 + $0x28] sm:$0xff] %vm436_vm2, %v431_v47  ;;  %v433_v48 = vpop.xlane.xlu0 %432 }
 0x19b   : > { %443 = vst.msk [vmem:[#allocation3 + $0x30] sm:$0xff] %vm436_vm2, %v433_v48 }
 0x19d   : > { %v435_v49 = vpop.xlane.xlu1 %434 }
 0x19e   : > { %444 = vst.msk [vmem:[#allocation3 + $0x38] sm:$0xff] %vm436_vm2, %v435_v49 }
 0x1f3   : > { %v514_v50 = vpop.f32.mrb[0].mxu1 }
 0x1f4   : > { %519 = vst.msk [vmem:[#allocation4] sm:$0x1] %vm518_vm3, %v514_v50  ;;  %v909_v51 = vpop.f32.mrb[1].mxu1 }
 0x1f5 PF: > { %s833_s8 = sshll.u32 %s1115_s18, 5  ;;  %v1136_v52 = vmov 0   ;;  %v620_v57 = vld [vmem:[#allocation2] sm:$0xff]  ;;  %v621_v58 = vld [vmem:[#allocation2 + $0x8] sm:$0xff]  ;;  %v622_v59 = vld [vmem:[#allocation2 + $0x10] sm:$0xff]  ;;  %vm605_vm13 = vcmask 523264  }
 0x1f6   : > { %1020 = vset.pattern.permute.xlu1 %v1136_v52  ;;  %1019 = vset.pattern.permute.xlu0 %v1136_v52  ;;  %s521_s25 = scalar_lea.vmem [#allocation3], %s833_s8  ;;  %v623_v60 = vld [vmem:[#allocation2 + $0x18] sm:$0xff]  ;;  %v569_v12 = vld [vmem:[%s1249_s24] sm:$0xf]  ;;  %v571_v17 = vld [vmem:[%s1249_s24 + $0x8] sm:$0xf] }
 0x1f7   : > { %v524_v53 = vld [vmem:[%s521_s25 + $0x10] sm:$0xff]  ;;  %v522_v54 = vld [vmem:[%s521_s25] sm:$0xff]  ;;  %v525_v55 = vld [vmem:[%s521_s25 + $0x18] sm:$0xff]  ;;  %910 = vmatprep.subr.bf16.mxu0 %v620_v57  ;;  %vm573_vm8 = vcmp.gt.bf16.partialorder %v569_v12, 0  ;;  %vm575_vm9 = vcmp.gt.bf16.partialorder %v571_v17, 0  ;;  %s839_s18 = sshll.u32 %s1119_s19, 3 }
 0x1f8   : > { %539 = vperm.xlu1 %1020, %v524_v53   ;;  %529 = vperm.xlu0 %1019, %v522_v54   ;;  %v523_v56 = vld [vmem:[%s521_s25 + $0x8] sm:$0xff]  ;;  %v570_v23 = vld [vmem:[%s1249_s24 + $0x4] sm:$0xf]  ;;  %v589_v26 = vsel %vm573_vm8, 65537, %v1136_v52  ;;  %v591_v27 = vsel %vm575_vm9, 65537, %v1136_v52  ;;  %s711_s10 = sshll.u32 %s1259_s20, 4  ;;  %s1329_s10 = int_to_ptr.vmem [resolvable:$true] %s711_s10 }
 0x1f9   : > { %911 = vmatpush3.bf16.msra.mxu0 %v620_v57  ;;  %v572_v20 = vld [vmem:[%s1249_s24 + $0xc] sm:$0xf]  ;;  %vm574_vm11 = vcmp.gt.bf16.partialorder %v570_v23, 0  ;;  %v593_v28 = vunpack.c.l.b16 %v589_v26  ;;  %v595_v31 = vunpack.c.l.b16 %v591_v27  ;;  %s708_s24 = sadd.s32 %s839_s18, %s1238_s9  ;;  %s1404_s14 = sand.u32 1, %s1107_s16  }
 0x1fa   : > { %912 = vmatprep.subr.bf16.mxu0 %v621_v58  ;;  %vm576_vm10 = vcmp.gt.bf16.partialorder %v572_v20, 0  ;;  %v590_v30 = vsel %vm574_vm11, 65537, %v1136_v52  ;;  %s840_s26 = sshll.u32 %s708_s24, 7  ;;  %s1336_s23 = scalar_lea.sflag [#allocation6], %s1404_s14 }
 0x1fb   : > { %v834_v61 = vld [vmem:[#allocation4] ss:$0 sm:$0xff]  ;;  %v592_v29 = vsel %vm576_vm10, 65537, %v1136_v52  ;;  %vm597_vm12 = vcmp.ne.s32.totalorder %v593_v28, 0  ;;  %v594_v33 = vunpack.c.l.b16 %v590_v30  ;;  %vm599_vm14 = vcmp.ne.s32.totalorder %v595_v31, 0  ;;  %s1327_s12 = scalar_lea.hbm %s1392_s4, %s840_s26  ;;  %s1037_s27 = scalar_lea.vmem %s1329_s10, 512 }
 0x1fc   : > { %544 = vperm.xlu1 %1020, %v525_v55   ;;  %534 = vperm.xlu0 %1019, %v523_v56   ;;  %v596_v32 = vunpack.c.l.b16 %v592_v29  ;;  %p1038_p1 = scmp.ne.s32.totalorder %s1329_s10, %s1037_s27  ;;  %s1137_s30 = smov [#allocation5]  }
 0x1fd   : > { %913 = vmatpush3.bf16.msra.mxu0 %v621_v58  ;;  %vm598_vm0 = vcmp.ne.s32.totalorder %v594_v33, 0  ;;  %s1041_s5 = sshll.u32 %s1137_s30, 4  ;;  %s1042_s5 = int_to_ptr.vmem [resolvable:$false] %s1041_s5 }
 0x1fe   : > { %914 = vmatprep.subr.bf16.mxu0 %v622_v59  ;;  %vm600_vm15 = vcmp.ne.s32.totalorder %v596_v32, 0  ;;  %p1039_p2 = pnand %p1038_p1, %p1216_p3  ;;  %s1043_s6 = scalar_lea.vmem %s1042_s5, 1024 }
 0x1ff   : > { %p1044_p5 = scmp.lt.s32.totalorder %s1329_s10, %s1042_s5  ;;  %p1045_p6 = scmp.lt.s32.totalorder %s1043_s6, %s1037_s27 }
 0x200   : > { %p1040_p4 = pneg %p1039_p2 }
 0x201   : > { %915 = vmatpush3.bf16.msra.mxu0 %v622_v59  ;;  %p1046_p7 = por %p1045_p6, %p1044_p5 }
 0x202   : > { %916 = vmatprep.subr.bf16.mxu0 %v623_v60 }
 0x203   : > { %p1047_p9 = pnand %p1046_p7, %p1040_p4 }
 0x205   : > { %917 = vmatpush3.bf16.msra.mxu0 %v623_v60 }
 0x277   : > { %v540_v62 = vpop.permute.xlu1 %539  ;;  %v530_v63 = vpop.permute.xlu0 %529 }
 0x278   : > { %v555_v0 = vadd.f32 %v834_v61, %v540_v62  ;;  %v553_v1 = vadd.f32 %v834_v61, %v530_v63 }
 0x27a   : > { %vm559_vm4 = vcmp.gt.f32.partialorder %v555_v0, 0.0  ;;  %v563_v2 = vmul.f32 0.2, %v555_v0  ;;  %vm557_vm5 = vcmp.gt.f32.partialorder %v553_v1, 0.0  ;;  %v561_v3 = vmul.f32 0.2, %v553_v1 }
 0x27b   : > { %v545_v4 = vpop.permute.xlu1 %544  ;;  %v535_v5 = vpop.permute.xlu0 %534 }
 0x27c   : > { %v567_v6 = vsel %vm559_vm4, %v555_v0, %v563_v2  ;;  %v565_v7 = vsel %vm557_vm5, %v553_v1, %v561_v3  ;;  %v556_v8 = vadd.f32 %v834_v61, %v545_v4  ;;  %v554_v9 = vadd.f32 %v834_v61, %v535_v5 }
 0x27d   : > { %v579_v10 = vsub.f32 0.0, %v567_v6  ;;  %v577_v11 = vsub.f32 0.0, %v565_v7 }
 0x27e   : > { %vm560_vm6 = vcmp.gt.f32.partialorder %v556_v8, 0.0  ;;  %v564_v13 = vmul.f32 0.2, %v556_v8  ;;  %vm558_vm7 = vcmp.gt.f32.partialorder %v554_v9, 0.0  ;;  %v562_v14 = vmul.f32 0.2, %v554_v9 }
 0x27f   : > { %v585_v15 = vmul.f32 1.442695, %v579_v10  ;;  %v581_v16 = vmul.f32 1.442695, %v577_v11 }
 0x280   : > { %v568_v18 = vsel %vm560_vm6, %v556_v8, %v564_v13  ;;  %v566_v19 = vsel %vm558_vm7, %v554_v9, %v562_v14 }
 0x281   : > { %1021 = vpow2.f32 %v585_v15  ;;  %v580_v21 = vsub.f32 0.0, %v568_v18  ;;  %v578_v22 = vsub.f32 0.0, %v566_v19 }
 0x282   : > { %1023 = vpow2.f32 %v581_v16 }
 0x283   : > { %v587_v24 = vmul.f32 1.442695, %v580_v21  ;;  %v583_v25 = vmul.f32 1.442695, %v578_v22 }
 0x285   : > { %1025 = vpow2.f32 %v587_v24 }
 0x286   : > { %1027 = vpow2.f32 %v583_v25 }
 0x28b   : > { %v1022_v34 = vpop.eup %1021 }
 0x28c   : > { %v1024_v35 = vpop.eup %1023  ;;  %v603_v39 = vsel %vm599_vm14, %v1022_v34, 0.0 }
 0x28d   : > { %v601_v36 = vsel %vm597_vm12, %v1024_v35, 0.0  ;;  %v612_v44 = vsel %vm605_vm13, %v603_v39, 0.0 }
 0x28e   : > { %v606_v37 = vsel %vm605_vm13, %v601_v36, 0.0 }
 0x28f   : > { %v1026_v38 = vpop.eup %1025  ;;  %607 = vadd.xlane.f32.xlu0 %v606_v37 }
 0x290   : > { %v1028_v40 = vpop.eup %1027  ;;  %v604_v41 = vsel %vm600_vm15, %v1026_v38, 0.0 }
 0x291   : > { %v619_v42 = vpack.c.bf16 %v604_v41, %v603_v39  ;;  %v602_v43 = vsel %vm598_vm0, %v1028_v40, 0.0  ;;  %v615_v47 = vsel %vm605_vm13, %v604_v41, 0.0 }
 0x292   : > { %v609_v45 = vsel %vm605_vm13, %v602_v43, 0.0  ;;  %v618_v46 = vpack.c.bf16 %v602_v43, %v601_v36 }
 0x293   : > { %613 = vadd.xlane.f32.xlu0 %v612_v44  ;;  %610 = vadd.xlane.f32.xlu1 %v609_v45 }
 0x294   : > { %918 = vmatprep.mubr.msk.bf16.mxu0 %vm605_vm13, %v618_v46 }
 0x295   : > { %919 = vmatmul.mubr.msk.bf16.vlgmr.msra.gmra.mrb[0].mxu0 %vm605_vm13, %v619_v42 }
 0x297   : > { %616 = vadd.xlane.f32.xlu0 %v615_v47 }
 0x31c   : > { %v608_v48 = vpop.xlane.xlu0 %607 }
 0x31d   : > { %v679_v53 = vadd.f32 1e-12, %v608_v48 }
 0x320   : > { %v614_v49 = vpop.xlane.xlu0 %613  ;;  %v611_v51 = vpop.xlane.xlu1 %610 }
 0x321   : > { %v681_v52 = vadd.f32 1e-12, %v614_v49  ;;  %v680_v55 = vadd.f32 1e-12, %v611_v51 }
 0x323   : > { %1029 = vrcp.f32 %v681_v52 }
 0x324   : > { %v617_v50 = vpop.xlane.xlu0 %616  ;;  %1031 = vrcp.f32 %v679_v53 }
 0x325   : > { %v682_v54 = vadd.f32 1e-12, %v617_v50 }
 0x327   : > { %1033 = vrcp.f32 %v682_v54 }
 0x328   : > { %1035 = vrcp.f32 %v680_v55 }
 0x32d   : > { %v1030_v56 = vpop.eup %1029 }
 0x32e   : > { %v1032_v58 = vpop.eup %1031 }
 0x331   : > { %v1034_v61 = vpop.eup %1033 }
 0x332   : > { %v1036_v0 = vpop.eup %1035 }
 0x368   : > { %v920_v57 = vpop.f32.mrb[0].mxu0 }
 0x369   : > { %v689_v59 = vmul.f32 %v1030_v56, %v920_v57  ;;  %v664_v60 = vpop.f32.mrb[1].mxu0 }
 0x36a   : > { %v687_v62 = vmul.f32 %v1032_v58, %v664_v60  ;;  %v921_v63 = vpop.f32.mrb[2].mxu0 }
 0x36b   : > { %693 = vst [vmem:[%s1259_s20 + $0x10] sm:$0xff] %v689_v59  ;;  %v690_v1 = vmul.f32 %v1034_v61, %v921_v63  ;;  %v667_v2 = vpop.f32.mrb[3].mxu0 }
 0x36c   : > { %691 = vst [vmem:[%s1259_s20] sm:$0xff] %v687_v62  ;;  %v688_v3 = vmul.f32 %v1036_v0, %v667_v2 }
 0x36d   : > { %694 = vst [vmem:[%s1259_s20 + $0x18] sm:$0xff] %v690_v1 }
 0x36e   : > { %692 = vst [vmem:[%s1259_s20 + $0x8] sm:$0xff] %v688_v3 }
 0x36f   : > { %1050 = shalt.err (!%p1047_p9)
}
 0x370   : > { %s1051_s20 = scalar_lea.hbm %s1327_s12, 512  ;;  %s1055_s21 = scalar_lea.hbm %s1392_s4, 2048 }
 0x371   : > { %p1052_p10 = scmp.ne.s32.totalorder %s1327_s12, %s1051_s20  ;;  %p1056_p13 = scmp.lt.u32.totalorder %s1327_s12, %s1392_s4 }
 0x372   : > { %p1057_p0 = scmp.lt.u32.totalorder %s1055_s21, %s1051_s20  ;;  %p1059_p2 = scmp.lt.u32.totalorder %s1051_s20, %s1327_s12 }
 0x373   : > { %p1053_p11 = pnand %p1052_p10, %p1216_p3 }
 0x374   : > { %p1058_p1 = por %p1057_p0, %p1056_p13 }
 0x375   : > { %p1054_p12 = pneg %p1053_p11 }
 0x376   : > { %p1060_p4 = por %p1059_p2, %p1058_p1 }
 0x378   : > { %p1061_p5 = pnand %p1060_p4, %p1054_p12 }
 0x37a   : > { %1064 = shalt.err (!%p1061_p5)
}
 0x37b   : > { %s1138_s18 = smov 128   ;;  %s1139_s24 = smov 8  }
 0x37c   : > { %942 = dma.vmem_to_hbm [thread:$0]  (%p1216_p3), %s1329_s10, 512, %s1327_s12, %s1336_s23, %s1138_s18, %s1138_s18, %s1139_s24  }
 0x37d PF: > { %p948_p6 = scmp.ge.s32.totalorder %s1131_s22, 2  ;;  %s726_s26 = sand.u32 1, %s1103_s15  }
 0x37e   : > { %s727_s19 = scalar_lea.sflag [#allocation6], %s726_s26 }
 0x37f   : > { %p945_p7 = pnand %p948_p6, %p1225_p8 }
 0x381   : > { %1098 = dma.done.wait (!%p945_p7), %s727_s19, 512  }
 0x382   : > { %1100 = vsyncadd (!%p945_p7), %s727_s19, 4294966784  ;;  %s17_s22 = sadd.s32 1, %s1131_s22   ;;  %s1405_s18 = sld [smem:[#allocation8_spill]] }
 0x383   : > { %p14_p9 = scmp.ge.s32.totalorder %s17_s22, 6   ;;  %s1406_s19 = sld [smem:[#allocation9_spill]] }
 0x384   : > { %s1407_s20 = sld [smem:[#allocation10_spill]]  ;;  %s1408_s21 = sld [smem:[#allocation11_spill]] }
 0x385   : > { %s1409_s15 = smov %s1107_s16  ;;  %s1410_s16 = smov %s1111_s17 }
 0x386   : > { %s1411_s17 = smov %s1234_s7  ;;  %16 = sbr.rel (!%p14_p9) target bundleno = 5 (0x5), region = 82 }
 0x38d   :  { %732 = vsyncpa [#allocation6], 1 }
 0x38e   :  { %734 = vsyncpa [#allocation6 + $0x1], 1 }

</bundles_post_ra>
